<compile_context>
chip_gen: v5e
topology: v5e:2x2
jax: 0.10.0
libtpu: 0.0.40
codegen_flags: <defaults>
</compile_context>

<pallas_src>
import math

import jax
import jax.numpy as jnp
from jax.experimental import pallas as pl
from jax.experimental.pallas import tpu as pltpu

_SMALL_BYTES = 1 << 20  # below this, a pallas copy is pure launch/HBM overhead
_MAX_DMA_CHUNKS = 4     # a handful of row-chunk DMAs is enough to saturate HBM


def _make_dma_copy_kernel(chunks):
    """HBM->HBM identity copy: chunked async DMAs, no VMEM staging."""

    def kernel(x_hbm, o_hbm, sems):
        copies = []
        for i, (start, size) in enumerate(chunks):
            cp = pltpu.make_async_copy(
                x_hbm.at[pl.ds(start, size)],
                o_hbm.at[pl.ds(start, size)],
                sems.at[i],
            )
            cp.start()
            copies.append(cp)
        for cp in copies:
            cp.wait()

    return kernel


def _row_chunks(n, row_bytes):
    """Split the batch axis into <= _MAX_DMA_CHUNKS contiguous row ranges,
    aiming for >= ~1 MiB per DMA so tiny arrays stay a single transfer."""
    total = max(1, n * row_bytes)
    target = -(-total // _SMALL_BYTES)  # ceil-div: chunks of ~1 MiB+
    nchunks = max(1, min(_MAX_DMA_CHUNKS, n, target))
    base, rem = divmod(n, nchunks)
    chunks, start = [], 0
    for i in range(nchunks):
        size = base + (1 if i < rem else 0)
        if size:
            chunks.append((start, size))
            start += size
    return chunks


def _pallas_copy(x2):
    """Materialize (n, flat) -> fresh (n, flat) buffer via HBM->HBM DMA."""
    n, flat = x2.shape
    itemsize = jnp.dtype(x2.dtype).itemsize
    chunks = _row_chunks(n, flat * itemsize)
    return pl.pallas_call(
        _make_dma_copy_kernel(chunks),
        out_shape=jax.ShapeDtypeStruct((n, flat), x2.dtype),
        in_specs=[pl.BlockSpec(memory_space=pl.ANY)],
        out_specs=pl.BlockSpec(memory_space=pl.ANY),
        scratch_shapes=[pltpu.SemaphoreType.DMA((len(chunks),))],
        cost_estimate=pl.CostEstimate(
            flops=0,
            transcendentals=0,
            bytes_accessed=2 * n * flat * itemsize,
        ),
    )(x2)


def view_op(x, *, copy=None):
    """Pallas implementation of ViewOP.forward: (N, ...) -> (N, prod(rest)).

    copy=None/False: zero-cost metadata reshape (exact .view semantics).
    copy=True:       additionally materialize the result with the Pallas
                     HBM->HBM DMA copy kernel.
    """
    n = x.shape[0]
    flat = math.prod(x.shape[1:])  # == 1 for 1-D input, matches .view(N, -1)

    # Zero-cost flatten (metadata-only reshape) — this IS the view.
    x2 = jnp.reshape(x, (n, flat))

    nbytes = n * flat * jnp.dtype(x.dtype).itemsize
    if copy is None:
        copy = False  # .view never copies; fast path is the default
    if (not copy) or nbytes == 0:
        return x2
    return _pallas_copy(x2)


if __name__ == "__main__":
    # ViewOP.__init__(*shape) stores an unused shape tuple; no parameters.
    key = jax.random.PRNGKey(0)
    x = jax.random.normal(key, (2, 4, 16, 16), dtype=jnp.float32)

    # Reference: torch .view on contiguous NCHW == row-major reshape.
    ref = x.reshape(x.shape[0], -1)

    # Default path: metadata-only reshape (what .view actually does).
    out_view = view_op(x)
    jax.block_until_ready(out_view)
    assert out_view.shape == (2, 4 * 16 * 16)
    assert out_view.dtype == x.dtype
    assert bool(jnp.array_equal(out_view, ref))

    # Forced-copy path: exercise the Pallas HBM->HBM DMA kernel once.
    out_copy = view_op(x, copy=True)
    jax.block_until_ready(out_copy)
    assert out_copy.shape == ref.shape
    assert out_copy.dtype == x.dtype
    assert bool(jnp.array_equal(out_copy, ref))

    print("KERNEL_OK")
</pallas_src>

<mosaic_0001>
module attributes {stable_mosaic.version = 11 : i64} {
  func.func @kernel(%arg0: memref<2x1024xf32, #tpu.memory_space<any>>, %arg1: memref<2x1024xf32, #tpu.memory_space<any>>, %arg2: memref<1x!tpu.dma_semaphore, #tpu.memory_space<semaphore_mem>>) attributes {dimension_semantics = [], scalar_prefetch = 0 : i64, scratch_operands = 1 : i64, tpu.core_type = #tpu.core_type<tc>} {
    %c0_i32 = arith.constant 0 : i32
    %c0_i32_0 = arith.constant 0 : i32
    %c0_i32_1 = arith.constant 0 : i32
    %0 = tpu.memref_slice %arg0[%c0_i32_0, %c0_i32_1] : memref<2x1024xf32, #tpu.memory_space<any>> -> memref<2x1024xf32, #tpu.memory_space<any>>
    %c0_i32_2 = arith.constant 0 : i32
    %c0_i32_3 = arith.constant 0 : i32
    %1 = tpu.memref_slice %arg1[%c0_i32_2, %c0_i32_3] : memref<2x1024xf32, #tpu.memory_space<any>> -> memref<2x1024xf32, #tpu.memory_space<any>>
    %2 = tpu.memref_slice %arg2[%c0_i32] : memref<1x!tpu.dma_semaphore, #tpu.memory_space<semaphore_mem>> -> memref<1x!tpu.dma_semaphore, #tpu.memory_space<semaphore_mem>>
    %3 = tpu.memref_squeeze %2 : memref<1x!tpu.dma_semaphore, #tpu.memory_space<semaphore_mem>> -> memref<!tpu.dma_semaphore, #tpu.memory_space<semaphore_mem>>
    tpu.enqueue_dma source(%0 : memref<2x1024xf32, #tpu.memory_space<any>>) target(%1 : memref<2x1024xf32, #tpu.memory_space<any>>) target_semaphore(%3 : memref<!tpu.dma_semaphore, #tpu.memory_space<semaphore_mem>>)
    %c0_i32_4 = arith.constant 0 : i32
    %c0_i32_5 = arith.constant 0 : i32
    %c0_i32_6 = arith.constant 0 : i32
    %4 = tpu.memref_slice %arg0[%c0_i32_5, %c0_i32_6] : memref<2x1024xf32, #tpu.memory_space<any>> -> memref<2x1024xf32, #tpu.memory_space<any>>
    %c0_i32_7 = arith.constant 0 : i32
    %c0_i32_8 = arith.constant 0 : i32
    %5 = tpu.memref_slice %arg1[%c0_i32_7, %c0_i32_8] : memref<2x1024xf32, #tpu.memory_space<any>> -> memref<2x1024xf32, #tpu.memory_space<any>>
    %6 = tpu.memref_slice %arg2[%c0_i32_4] : memref<1x!tpu.dma_semaphore, #tpu.memory_space<semaphore_mem>> -> memref<1x!tpu.dma_semaphore, #tpu.memory_space<semaphore_mem>>
    %7 = tpu.memref_squeeze %6 : memref<1x!tpu.dma_semaphore, #tpu.memory_space<semaphore_mem>> -> memref<!tpu.dma_semaphore, #tpu.memory_space<semaphore_mem>>
    tpu.wait_dma2 semaphore(%7 : memref<!tpu.dma_semaphore, #tpu.memory_space<semaphore_mem>>) src(%4 : memref<2x1024xf32, #tpu.memory_space<any>>) dst(%5 : memref<2x1024xf32, #tpu.memory_space<any>>)
    return
  }
}

</mosaic_0001>

<bundles_post_ra>
// kernel: tpu_custom_call.1
= control target key start
LH: loop header
LB: loop body
LE: loop exit
PB: predicated region body
PF: predicated region fallthrough
CT: control target
= control target key end

     0   :  { %s33_s12 = smov [#allocation2]   ;;  %s34_s13 = smov [#allocation3]   ;;  %s52_s0 = inlined_call_operand.hbm [shape: f32[2,1024], index: 0, kind: input, shape index: {}]   ;;  %s53_s1 = inlined_call_operand.hbm [shape: f32[2,1024], index: 1, kind: output, shape index: {}]  }
   0x1   :  { %s10_s8 = sshll.u32 %s52_s0, 4  ;;  %s12_s11 = sshll.u32 %s53_s1, 4  ;;  %s11_s8 = int_to_ptr.hbm [resolvable:$true] %s10_s8  ;;  %s13_s11 = int_to_ptr.hbm [resolvable:$true] %s12_s11 }
   0x2   :  { %s35_s14 = smov 0  }
   0x3   :  { %16 = dma.general %s11_s8, 256, %s13_s11, %s33_s12, %s34_s13, [#allocation4], %s35_s14, 0  }
   0x4   :  { %31 = dma.done.wait [#allocation2], 256 }
   0x5   :  { %32 = vsyncadd [#allocation2], 4294967040 }
   0x6   :  { %21 = vsyncmov [#allocation2] }
   0x9   :  { %s22_s15 = vpop.sfrf %21 }
   0xa   :  { %p27_p0 = scmp.ne.s32.totalorder %s22_s15, 0 }
   0xc   :  { %26 = shalt.err (%p27_p0)  }

</bundles_post_ra>
